<compile_context>
chip_gen: v7x
topology: tpu7x:2x2x1
jax: 0.10.0
libtpu: 0.0.40
codegen_flags: <defaults>
</compile_context>

<pallas_src>
import numpy as np
import jax
import jax.numpy as jnp
from jax.experimental import pallas as pl
from jax.experimental.pallas import tpu as pltpu


# ----------------------------------------------------------------------------
# Host-side construction of the pooling / upsampling factors (PyTorch
# semantics: adaptive_avg_pool2d regions; bilinear interpolate, align_corners
# False).  They are folded per-scale into a (H*W, S*S) pooling matrix and a
# (S*S, H*W) upsampling matrix (S = max scale, zero-padded for small scales).
# ----------------------------------------------------------------------------
def _adaptive_avg_pool_matrix(in_size, out_size):
    A = np.zeros((out_size, in_size), dtype=np.float32)
    for i in range(out_size):
        start = (i * in_size) // out_size
        end = -(-((i + 1) * in_size) // out_size)  # ceil
        A[i, start:end] = 1.0 / (end - start)
    return A


def _bilinear_upsample_matrix(in_size, out_size):
    # F.upsample(..., mode='bilinear') == interpolate(align_corners=False)
    U = np.zeros((out_size, in_size), dtype=np.float32)
    scale = in_size / out_size
    for o in range(out_size):
        src = scale * (o + 0.5) - 0.5
        if src < 0.0:
            src = 0.0
        i0 = int(np.floor(src))
        i1 = i0 + 1 if i0 < in_size - 1 else i0
        lam = src - i0
        U[o, i0] += 1.0 - lam
        U[o, i1] += lam
    return U


def prepare_params(w_scales, wn, bn_vec, wb, bb_vec, sizes, H, W):
    """Pack PyTorch-layout parameters into the kernel's streaming layout."""
    C = wn.shape[0]
    n_scales = len(sizes)
    smax = max(sizes)
    SS = smax * smax
    pt = np.zeros((n_scales, H * W, SS), np.float32)   # x @ pt -> pooled
    ut = np.zeros((n_scales, SS, H * W), np.float32)   # pooled' @ ut -> upsampled
    for k, s in enumerate(sizes):
        ah = np.zeros((smax, H), np.float32)
        aw = np.zeros((smax, W), np.float32)
        uh = np.zeros((H, smax), np.float32)
        uw = np.zeros((W, smax), np.float32)
        ah[:s] = _adaptive_avg_pool_matrix(H, s)
        aw[:s] = _adaptive_avg_pool_matrix(W, s)
        uh[:, :s] = _bilinear_upsample_matrix(s, H)
        uw[:, :s] = _bilinear_upsample_matrix(s, W)
        pt[k] = np.kron(ah, aw).T          # (H*W, S*S)
        ut[k] = np.kron(uh, uw).T          # (S*S, H*W)
    bf16 = jnp.bfloat16
    return (jnp.asarray(w_scales, bf16),               # (n_scales, C, C)
            jnp.asarray(pt, bf16),                     # (n_scales, H*W, S*S)
            jnp.asarray(ut, bf16),                     # (n_scales, S*S, H*W)
            jnp.asarray(wn, bf16),                     # (C, C)
            jnp.asarray(bn_vec, jnp.float32).reshape(C, 1),
            jnp.asarray(wb[:, :C], bf16),              # bottleneck on `overall`
            jnp.asarray(wb[:, C:], bf16),              # bottleneck on `feats`
            jnp.asarray(bb_vec, jnp.float32).reshape(-1, 1))


# ----------------------------------------------------------------------------
# Pallas kernel: one (batch, scale) grid step.
# ----------------------------------------------------------------------------
def _contextual_kernel(x_ref, ws_ref, pt_ref, ut_ref, wn_ref, bn_ref,
                       wb1_ref, wb2_ref, bb_ref, o_ref, num_acc, den_acc):
    s = pl.program_id(1)
    last = pl.num_programs(1) - 1

    @pl.when(s == 0)
    def _():
        num_acc[...] = jnp.zeros_like(num_acc)
        den_acc[...] = jnp.zeros_like(den_acc)

    xf = x_ref[...]                                              # (C, HW) bf16

    # adaptive avg-pool (both spatial axes folded): deep contraction over HW.
    pooled = jnp.dot(xf, pt_ref[...],
                     preferred_element_type=jnp.float32)         # (C, SS) f32
    # per-scale 1x1 conv applied only on the tiny pooled map.
    z = jnp.dot(ws_ref[...], pooled.astype(jnp.bfloat16),
                preferred_element_type=jnp.float32)              # (C, SS) f32
    # bilinear upsample back to the full lane-dense map.
    ms = jnp.dot(z.astype(jnp.bfloat16), ut_ref[...],
                 preferred_element_type=jnp.float32)             # (C, HW) f32

    # weight = sigmoid(weight_net(feats - multi_scale))
    diff = (xf.astype(jnp.float32) - ms).astype(jnp.bfloat16)
    logits = jnp.dot(wn_ref[...], diff,
                     preferred_element_type=jnp.float32) + bn_ref[...]
    w = jax.nn.sigmoid(logits)                                   # (C, HW) f32

    num_acc[...] += ms * w
    den_acc[...] += w

    @pl.when(s == last)
    def _():
        overall = num_acc[...] * pl.reciprocal(den_acc[...], approx=True)
        out = jnp.dot(wb1_ref[...], overall.astype(jnp.bfloat16),
                      preferred_element_type=jnp.float32)
        out = out + jnp.dot(wb2_ref[...], xf,
                            preferred_element_type=jnp.float32)
        out = out + bb_ref[...]
        o_ref[...] = jnp.maximum(out, 0.0)                       # ReLU


def contextual_module(x, params):
    """x: (N, C, H, W) float32; returns (N, Cout, H, W) float32."""
    w_scales, pt, ut, wn, bn, wb1, wb2, bb = params
    N, C, H, W = x.shape
    HW = H * W
    SS = pt.shape[-1]
    n_scales = w_scales.shape[0]
    Cout = wb1.shape[0]

    # Lane-dense activations: last dim H*W (ideally a multiple of 128); bf16
    # halves the HBM<->VMEM traffic for the streamed blocks.
    xf = x.reshape(N, C, HW).astype(jnp.bfloat16)

    # Explicit VMEM budget from the block shapes (double-buffered I/O blocks,
    # resident weights, scratch accumulators, f32 temporaries) + headroom.
    est = (2 * C * HW * 2                      # x block (bf16, double buffered)
           + 2 * Cout * HW * 4                 # out block (f32)
           + 2 * (C * C + 2 * HW * SS) * 2     # per-scale Ws / pool / upsample
           + 2 * (C * C + 2 * Cout * C) * 2    # wn, wb1, wb2
           + 2 * (C + Cout) * 4                # biases
           + 2 * C * HW * 4                    # num/den scratch
           + 6 * C * HW * 4)                   # in-kernel f32 temporaries
    vmem_limit = int(min(64 * 1024 * 1024, max(16 * 1024 * 1024, 2 * est)))

    out = pl.pallas_call(
        _contextual_kernel,
        out_shape=jax.ShapeDtypeStruct((N, Cout, HW), jnp.float32),
        grid=(N, n_scales),
        in_specs=[
            pl.BlockSpec((None, C, HW), lambda n, s: (n, 0, 0)),    # x (resident over s)
            pl.BlockSpec((None, C, C), lambda n, s: (s, 0, 0)),     # Ws[s]
            pl.BlockSpec((None, HW, SS), lambda n, s: (s, 0, 0)),   # pool^T[s]
            pl.BlockSpec((None, SS, HW), lambda n, s: (s, 0, 0)),   # upsample[s]
            pl.BlockSpec((C, C), lambda n, s: (0, 0)),              # weight_net W
            pl.BlockSpec((C, 1), lambda n, s: (0, 0)),              # weight_net b
            pl.BlockSpec((Cout, C), lambda n, s: (0, 0)),           # bottleneck W (overall half)
            pl.BlockSpec((Cout, C), lambda n, s: (0, 0)),           # bottleneck W (feats half)
            pl.BlockSpec((Cout, 1), lambda n, s: (0, 0)),           # bottleneck b
        ],
        out_specs=pl.BlockSpec((None, Cout, HW), lambda n, s: (n, 0, 0)),
        scratch_shapes=[pltpu.VMEM((C, HW), jnp.float32),           # num accumulator
                        pltpu.VMEM((C, HW), jnp.float32)],          # den accumulator
        compiler_params=pltpu.CompilerParams(
            dimension_semantics=("parallel", "arbitrary"),
            vmem_limit_bytes=vmem_limit),
    )(xf, w_scales, pt, ut, wn, bn, wb1, wb2, bb)

    return out.reshape(N, Cout, H, W)


def contextual_encoder(conv2_2, conv3_3, conv4_3, conv5_3, params):
    """ContextualEncoder.forward: only conv5_3 goes through the CAN module."""
    return conv2_2, conv3_3, conv4_3, contextual_module(conv5_3, params)


# ----------------------------------------------------------------------------
# Pure-JAX f32 reference (mirrors the PyTorch forward exactly) for a check.
# ----------------------------------------------------------------------------
def reference(x, w_scales, wn, bn_vec, wb, bb_vec, sizes):
    N, C, H, W = x.shape
    num = 0.0
    den = 0.0
    for k, s in enumerate(sizes):
        ah = jnp.asarray(_adaptive_avg_pool_matrix(H, s))
        aw = jnp.asarray(_adaptive_avg_pool_matrix(W, s))
        uh = jnp.asarray(_bilinear_upsample_matrix(s, H))
        uw = jnp.asarray(_bilinear_upsample_matrix(s, W))
        pooled = jnp.einsum('ih,nchw,jw->ncij', ah, x, aw)
        conv = jnp.einsum('oc,ncij->noij', w_scales[k], pooled)
        ms = jnp.einsum('hi,noij,wj->nohw', uh, conv, uw)
        logit = jnp.einsum('oc,nchw->nohw', wn, x - ms) + bn_vec[None, :, None, None]
        w = jax.nn.sigmoid(logit)
        num = num + ms * w
        den = den + w
    overall = num / den
    cat = jnp.concatenate([overall, x], axis=1)
    out = jnp.einsum('oc,nchw->nohw', wb, cat) + bb_vec[None, :, None, None]
    return jnp.maximum(out, 0.0)


if __name__ == "__main__":
    key = jax.random.PRNGKey(0)
    ks = jax.random.split(key, 8)

    # Small shapes consistent with the module (real model: features=512).
    N, C, H, W = 2, 8, 16, 16
    Cout = 8
    sizes = (1, 2, 3, 6)

    # Encoder inputs (conv2_2/3_3/4_3 pass through unchanged).
    conv2_2 = jax.random.normal(ks[0], (N, 4, 32, 32), jnp.float32)
    conv3_3 = jax.random.normal(ks[1], (N, 4, 16, 16), jnp.float32)
    conv4_3 = jax.random.normal(ks[2], (N, 4, 16, 16), jnp.float32)
    conv5_3 = jax.random.normal(ks[3], (N, C, H, W), jnp.float32)

    # Deterministic init matching _initialize_weights: conv ~ N(0, 0.01), bias 0.
    w_scales = 0.01 * jax.random.normal(ks[4], (len(sizes), C, C), jnp.float32)
    wn = 0.01 * jax.random.normal(ks[5], (C, C), jnp.float32)         # weight_net
    bn = jnp.zeros((C,), jnp.float32)
    wb = 0.01 * jax.random.normal(ks[6], (Cout, 2 * C), jnp.float32)  # bottleneck
    bb = jnp.zeros((Cout,), jnp.float32)

    params = prepare_params(np.asarray(w_scales), np.asarray(wn), np.asarray(bn),
                            np.asarray(wb), np.asarray(bb), sizes, H, W)

    o2, o3, o4, o5 = contextual_encoder(conv2_2, conv3_3, conv4_3, conv5_3, params)
    o5 = jax.block_until_ready(o5)

    ref = reference(conv5_3, w_scales, wn, bn, wb, bb, sizes)
    assert o5.shape == (N, Cout, H, W)
    max_err = float(jnp.max(jnp.abs(o5 - ref)))
    # bf16 MXU inputs + approx reciprocal => slightly relaxed tolerance.
    assert jnp.allclose(o5, ref, rtol=5e-2, atol=3e-3), f"max abs err {max_err}"

    print("KERNEL_OK")
</pallas_src>

<mosaic_0001>
module attributes {stable_mosaic.version = 11 : i64} {
  func.func @_contextual_kernel(%arg0: i32, %arg1: i32, %arg2: memref<1x8x256xbf16, #tpu.memory_space<vmem>>, %arg3: memref<1x8x8xbf16, #tpu.memory_space<vmem>>, %arg4: memref<1x256x36xbf16, #tpu.memory_space<vmem>>, %arg5: memref<1x36x256xbf16, #tpu.memory_space<vmem>>, %arg6: memref<8x8xbf16, #tpu.memory_space<vmem>>, %arg7: memref<8x1xf32, #tpu.memory_space<vmem>>, %arg8: memref<8x8xbf16, #tpu.memory_space<vmem>>, %arg9: memref<8x8xbf16, #tpu.memory_space<vmem>>, %arg10: memref<8x1xf32, #tpu.memory_space<vmem>>, %arg11: memref<1x8x256xf32, #tpu.memory_space<vmem>>, %arg12: memref<8x256xf32, #tpu.memory_space<vmem>>, %arg13: memref<8x256xf32, #tpu.memory_space<vmem>>) attributes {dimension_semantics = [#tpu.dimension_semantics<parallel>, #tpu.dimension_semantics<arbitrary>], iteration_bounds = array<i64: 2, 4>, scalar_prefetch = 0 : i64, scratch_operands = 2 : i64, tpu.core_type = #tpu.core_type<tc>, window_params = [{transform_indices = @transform_0, window_bounds = array<i64: 1, 8, 256>}, {transform_indices = @transform_1, window_bounds = array<i64: 1, 8, 8>}, {transform_indices = @transform_2, window_bounds = array<i64: 1, 256, 36>}, {transform_indices = @transform_3, window_bounds = array<i64: 1, 36, 256>}, {pipeline_mode = #tpu.pipeline_mode<synchronous>, transform_indices = @transform_4, window_bounds = array<i64: 8, 8>}, {pipeline_mode = #tpu.pipeline_mode<synchronous>, transform_indices = @transform_5, window_bounds = array<i64: 8, 1>}, {pipeline_mode = #tpu.pipeline_mode<synchronous>, transform_indices = @transform_6, window_bounds = array<i64: 8, 8>}, {pipeline_mode = #tpu.pipeline_mode<synchronous>, transform_indices = @transform_7, window_bounds = array<i64: 8, 8>}, {pipeline_mode = #tpu.pipeline_mode<synchronous>, transform_indices = @transform_8, window_bounds = array<i64: 8, 1>}, {transform_indices = @transform_9, window_bounds = array<i64: 1, 8, 256>}]} {
    %c0_i32 = arith.constant 0 : i32
    %0 = arith.cmpi eq, %arg1, %c0_i32 : i32
    %1 = arith.extui %0 : i1 to i32
    %c0_i32_0 = arith.constant 0 : i32
    %2 = arith.cmpi ne, %1, %c0_i32_0 : i32
    scf.if %2 {
      %cst_29 = arith.constant 0.000000e+00 : f32
      %39 = vector.broadcast %cst_29 : f32 to vector<8x256xf32>
      %c0_30 = arith.constant 0 : index
      %c0_31 = arith.constant 0 : index
      %40 = vector.load %arg12[%c0_30, %c0_31] : memref<8x256xf32, #tpu.memory_space<vmem>>, vector<8x256xf32>
      tpu.vector_store %arg12[%c0_30, %c0_31], %39 {strides = array<i32>} : memref<8x256xf32, #tpu.memory_space<vmem>>, vector<8x256xf32>,
      %cst_32 = arith.constant 0.000000e+00 : f32
      %41 = vector.broadcast %cst_32 : f32 to vector<8x256xf32>
      %c0_33 = arith.constant 0 : index
      %c0_34 = arith.constant 0 : index
      %42 = vector.load %arg13[%c0_33, %c0_34] : memref<8x256xf32, #tpu.memory_space<vmem>>, vector<8x256xf32>
      tpu.vector_store %arg13[%c0_33, %c0_34], %41 {strides = array<i32>} : memref<8x256xf32, #tpu.memory_space<vmem>>, vector<8x256xf32>,
    } else {
    }
    %c0 = arith.constant 0 : index
    %c0_1 = arith.constant 0 : index
    %c0_2 = arith.constant 0 : index
    %3 = vector.load %arg2[%c0, %c0_1, %c0_2] : memref<1x8x256xbf16, #tpu.memory_space<vmem>>, vector<1x8x256xbf16>
    %4 = vector.shape_cast %3 : vector<1x8x256xbf16> to vector<8x256xbf16>
    %c0_3 = arith.constant 0 : index
    %c0_4 = arith.constant 0 : index
    %c0_5 = arith.constant 0 : index
    %5 = vector.load %arg4[%c0_3, %c0_4, %c0_5] : memref<1x256x36xbf16, #tpu.memory_space<vmem>>, vector<1x256x36xbf16>
    %6 = vector.shape_cast %5 : vector<1x256x36xbf16> to vector<256x36xbf16>
    %cst = arith.constant dense<0.000000e+00> : vector<8x36xf32>
    %7 = tpu.matmul %4, %6, %cst {dimension_numbers = #tpu.dot_dimension_numbers<[1], [0], [0], [1], [0, 0, 1, 1], [], []>} : vector<8x256xbf16>, vector<256x36xbf16>, vector<8x36xf32> -> vector<8x36xf32>
    %c0_6 = arith.constant 0 : index
    %c0_7 = arith.constant 0 : index
    %c0_8 = arith.constant 0 : index
    %8 = vector.load %arg3[%c0_6, %c0_7, %c0_8] : memref<1x8x8xbf16, #tpu.memory_space<vmem>>, vector<1x8x8xbf16>
    %9 = vector.shape_cast %8 : vector<1x8x8xbf16> to vector<8x8xbf16>
    %10 = arith.truncf %7 : vector<8x36xf32> to vector<8x36xbf16>
    %cst_9 = arith.constant dense<0.000000e+00> : vector<8x36xf32>
    %11 = tpu.matmul %9, %10, %cst_9 {dimension_numbers = #tpu.dot_dimension_numbers<[1], [0], [0], [1], [0, 0, 1, 1], [], []>} : vector<8x8xbf16>, vector<8x36xbf16>, vector<8x36xf32> -> vector<8x36xf32>
    %12 = arith.truncf %11 : vector<8x36xf32> to vector<8x36xbf16>
    %c0_10 = arith.constant 0 : index
    %c0_11 = arith.constant 0 : index
    %c0_12 = arith.constant 0 : index
    %13 = vector.load %arg5[%c0_10, %c0_11, %c0_12] : memref<1x36x256xbf16, #tpu.memory_space<vmem>>, vector<1x36x256xbf16>
    %14 = vector.shape_cast %13 : vector<1x36x256xbf16> to vector<36x256xbf16>
    %cst_13 = arith.constant dense<0.000000e+00> : vector<8x256xf32>
    %15 = tpu.matmul %12, %14, %cst_13 {dimension_numbers = #tpu.dot_dimension_numbers<[1], [0], [0], [1], [0, 0, 1, 1], [], []>} : vector<8x36xbf16>, vector<36x256xbf16>, vector<8x256xf32> -> vector<8x256xf32>
    %16 = arith.extf %4 : vector<8x256xbf16> to vector<8x256xf32>
    %17 = arith.subf %16, %15 : vector<8x256xf32>
    %18 = arith.truncf %17 : vector<8x256xf32> to vector<8x256xbf16>
    %c0_14 = arith.constant 0 : index
    %c0_15 = arith.constant 0 : index
    %19 = vector.load %arg6[%c0_14, %c0_15] : memref<8x8xbf16, #tpu.memory_space<vmem>>, vector<8x8xbf16>
    %cst_16 = arith.constant dense<0.000000e+00> : vector<8x256xf32>
    %20 = tpu.matmul %19, %18, %cst_16 {dimension_numbers = #tpu.dot_dimension_numbers<[1], [0], [0], [1], [0, 0, 1, 1], [], []>} : vector<8x8xbf16>, vector<8x256xbf16>, vector<8x256xf32> -> vector<8x256xf32>
    %c0_17 = arith.constant 0 : index
    %c0_18 = arith.constant 0 : index
    %21 = vector.load %arg7[%c0_17, %c0_18] : memref<8x1xf32, #tpu.memory_space<vmem>>, vector<8x1xf32>
    %22 = vector.broadcast %21 : vector<8x1xf32> to vector<8x256xf32>
    %23 = arith.addf %20, %22 : vector<8x256xf32>
    %24 = arith.negf %23 : vector<8x256xf32>
    %25 = math.exp %24 : vector<8x256xf32>
    %cst_19 = arith.constant 1.000000e+00 : f32
    %26 = vector.broadcast %cst_19 : f32 to vector<8x256xf32>
    %27 = arith.addf %26, %25 : vector<8x256xf32>
    %28 = arith.divf %26, %27 : vector<8x256xf32>
    %c0_20 = arith.constant 0 : index
    %c0_21 = arith.constant 0 : index
    %29 = vector.load %arg12[%c0_20, %c0_21] : memref<8x256xf32, #tpu.memory_space<vmem>>, vector<8x256xf32>
    %30 = arith.mulf %15, %28 : vector<8x256xf32>
    %31 = arith.addf %29, %30 : vector<8x256xf32>
    %c0_22 = arith.constant 0 : index
    %c0_23 = arith.constant 0 : index
    %32 = vector.load %arg12[%c0_22, %c0_23] : memref<8x256xf32, #tpu.memory_space<vmem>>, vector<8x256xf32>
    tpu.vector_store %arg12[%c0_22, %c0_23], %31 {strides = array<i32>} : memref<8x256xf32, #tpu.memory_space<vmem>>, vector<8x256xf32>,
    %c0_24 = arith.constant 0 : index
    %c0_25 = arith.constant 0 : index
    %33 = vector.load %arg13[%c0_24, %c0_25] : memref<8x256xf32, #tpu.memory_space<vmem>>, vector<8x256xf32>
    %34 = arith.addf %33, %28 : vector<8x256xf32>
    %c0_26 = arith.constant 0 : index
    %c0_27 = arith.constant 0 : index
    %35 = vector.load %arg13[%c0_26, %c0_27] : memref<8x256xf32, #tpu.memory_space<vmem>>, vector<8x256xf32>
    tpu.vector_store %arg13[%c0_26, %c0_27], %34 {strides = array<i32>} : memref<8x256xf32, #tpu.memory_space<vmem>>, vector<8x256xf32>,
    %c3_i32 = arith.constant 3 : i32
    %36 = arith.cmpi eq, %arg1, %c3_i32 : i32
    %37 = arith.extui %36 : i1 to i32
    %c0_i32_28 = arith.constant 0 : i32
    %38 = arith.cmpi ne, %37, %c0_i32_28 : i32
    scf.if %38 {
      %c0_29 = arith.constant 0 : index
      %c0_30 = arith.constant 0 : index
      %39 = vector.load %arg12[%c0_29, %c0_30] : memref<8x256xf32, #tpu.memory_space<vmem>>, vector<8x256xf32>
      %c0_31 = arith.constant 0 : index
      %c0_32 = arith.constant 0 : index
      %40 = vector.load %arg13[%c0_31, %c0_32] : memref<8x256xf32, #tpu.memory_space<vmem>>, vector<8x256xf32>
      %41 = tpu.reciprocal %40 {approx = true} : vector<8x256xf32> -> vector<8x256xf32>
      %42 = arith.mulf %39, %41 : vector<8x256xf32>
      %c0_33 = arith.constant 0 : index
      %c0_34 = arith.constant 0 : index
      %43 = vector.load %arg8[%c0_33, %c0_34] : memref<8x8xbf16, #tpu.memory_space<vmem>>, vector<8x8xbf16>
      %44 = arith.truncf %42 : vector<8x256xf32> to vector<8x256xbf16>
      %cst_35 = arith.constant dense<0.000000e+00> : vector<8x256xf32>
      %45 = tpu.matmul %43, %44, %cst_35 {dimension_numbers = #tpu.dot_dimension_numbers<[1], [0], [0], [1], [0, 0, 1, 1], [], []>} : vector<8x8xbf16>, vector<8x256xbf16>, vector<8x256xf32> -> vector<8x256xf32>
      %c0_36 = arith.constant 0 : index
      %c0_37 = arith.constant 0 : index
      %46 = vector.load %arg9[%c0_36, %c0_37] : memref<8x8xbf16, #tpu.memory_space<vmem>>, vector<8x8xbf16>
      %cst_38 = arith.constant dense<0.000000e+00> : vector<8x256xf32>
      %47 = tpu.matmul %46, %4, %cst_38 {dimension_numbers = #tpu.dot_dimension_numbers<[1], [0], [0], [1], [0, 0, 1, 1], [], []>} : vector<8x8xbf16>, vector<8x256xbf16>, vector<8x256xf32> -> vector<8x256xf32>
      %48 = arith.addf %45, %47 : vector<8x256xf32>
      %c0_39 = arith.constant 0 : index
      %c0_40 = arith.constant 0 : index
      %49 = vector.load %arg10[%c0_39, %c0_40] : memref<8x1xf32, #tpu.memory_space<vmem>>, vector<8x1xf32>
      %50 = vector.broadcast %49 : vector<8x1xf32> to vector<8x256xf32>
      %51 = arith.addf %48, %50 : vector<8x256xf32>
      %cst_41 = arith.constant 0.000000e+00 : f32
      %52 = vector.broadcast %cst_41 : f32 to vector<8x256xf32>
      %53 = arith.maximumf %51, %52 : vector<8x256xf32>
      %c0_42 = arith.constant 0 : index
      %c0_43 = arith.constant 0 : index
      %c0_44 = arith.constant 0 : index
      %54 = vector.load %arg11[%c0_42, %c0_43, %c0_44] : memref<1x8x256xf32, #tpu.memory_space<vmem>>, vector<1x8x256xf32>
      %55 = vector.shape_cast %54 : vector<1x8x256xf32> to vector<8x256xf32>
      %56 = vector.shape_cast %53 : vector<8x256xf32> to vector<1x8x256xf32>
      tpu.vector_store %arg11[%c0_42, %c0_43, %c0_44], %56 {strides = array<i32>} : memref<1x8x256xf32, #tpu.memory_space<vmem>>, vector<1x8x256xf32>,
    } else {
    }
    return
  }
  func.func @transform_0(%arg0: i32, %arg1: i32) -> (i32, i32, i32) {
    %c0_i32 = arith.constant 0 : i32
    %c0_i32_0 = arith.constant 0 : i32
    %c0_i32_1 = arith.constant 0 : i32
    return %arg0, %c0_i32, %c0_i32_0 : i32, i32, i32
  }
  func.func @transform_1(%arg0: i32, %arg1: i32) -> (i32, i32, i32) {
    %c0_i32 = arith.constant 0 : i32
    %c0_i32_0 = arith.constant 0 : i32
    %c0_i32_1 = arith.constant 0 : i32
    return %arg1, %c0_i32, %c0_i32_0 : i32, i32, i32
  }
  func.func @transform_2(%arg0: i32, %arg1: i32) -> (i32, i32, i32) {
    %c0_i32 = arith.constant 0 : i32
    %c0_i32_0 = arith.constant 0 : i32
    %c0_i32_1 = arith.constant 0 : i32
    return %arg1, %c0_i32, %c0_i32_0 : i32, i32, i32
  }
  func.func @transform_3(%arg0: i32, %arg1: i32) -> (i32, i32, i32) {
    %c0_i32 = arith.constant 0 : i32
    %c0_i32_0 = arith.constant 0 : i32
    %c0_i32_1 = arith.constant 0 : i32
    return %arg1, %c0_i32, %c0_i32_0 : i32, i32, i32
  }
  func.func @transform_4(%arg0: i32, %arg1: i32) -> (i32, i32) {
    %c0_i32 = arith.constant 0 : i32
    %c0_i32_0 = arith.constant 0 : i32
    %c0_i32_1 = arith.constant 0 : i32
    return %c0_i32, %c0_i32_0 : i32, i32
  }
  func.func @transform_5(%arg0: i32, %arg1: i32) -> (i32, i32) {
    %c0_i32 = arith.constant 0 : i32
    %c0_i32_0 = arith.constant 0 : i32
    %c0_i32_1 = arith.constant 0 : i32
    return %c0_i32, %c0_i32_0 : i32, i32
  }
  func.func @transform_6(%arg0: i32, %arg1: i32) -> (i32, i32) {
    %c0_i32 = arith.constant 0 : i32
    %c0_i32_0 = arith.constant 0 : i32
    %c0_i32_1 = arith.constant 0 : i32
    return %c0_i32, %c0_i32_0 : i32, i32
  }
  func.func @transform_7(%arg0: i32, %arg1: i32) -> (i32, i32) {
    %c0_i32 = arith.constant 0 : i32
    %c0_i32_0 = arith.constant 0 : i32
    %c0_i32_1 = arith.constant 0 : i32
    return %c0_i32, %c0_i32_0 : i32, i32
  }
  func.func @transform_8(%arg0: i32, %arg1: i32) -> (i32, i32) {
    %c0_i32 = arith.constant 0 : i32
    %c0_i32_0 = arith.constant 0 : i32
    %c0_i32_1 = arith.constant 0 : i32
    return %c0_i32, %c0_i32_0 : i32, i32
  }
  func.func @transform_9(%arg0: i32, %arg1: i32) -> (i32, i32, i32) {
    %c0_i32 = arith.constant 0 : i32
    %c0_i32_0 = arith.constant 0 : i32
    %c0_i32_1 = arith.constant 0 : i32
    return %arg0, %c0_i32, %c0_i32_0 : i32, i32, i32
  }
}

</mosaic_0001>

<bundles_post_ra>
// kernel: tpu_custom_call.1
= control target key start
LH: loop header
LB: loop body
LE: loop exit
PB: predicated region body
PF: predicated region fallthrough
CT: control target
= control target key end

     0   :  { %s1633_s0 = inlined_call_operand.vmem [shape: bf16[2,8,256], index: 0, kind: input, shape index: {}]   ;;  %s1634_s1 = inlined_call_operand.vmem [shape: bf16[4,8,8], index: 1, kind: input, shape index: {}]   ;;  %s1635_s2 = inlined_call_operand.vmem [shape: bf16[4,256,36], index: 2, kind: input, shape index: {}]   ;;  %s1636_s3 = inlined_call_operand.vmem [shape: bf16[4,36,256], index: 3, kind: input, shape index: {}]   ;;  %s1637_s4 = inlined_call_operand.vmem [shape: bf16[8,8], index: 4, kind: input, shape index: {}]   ;;  %s1638_s5 = inlined_call_operand.vmem [shape: f32[8,1], index: 5, kind: input, shape index: {}]   ;;  %s1639_s6 = inlined_call_operand.vmem [shape: bf16[8,8], index: 6, kind: input, shape index: {}]   ;;  %s1640_s7 = inlined_call_operand.vmem [shape: bf16[8,8], index: 7, kind: input, shape index: {}]   ;;  %s1641_s8 = inlined_call_operand.vmem [shape: f32[8,1], index: 8, kind: input, shape index: {}]   ;;  %s1642_s9 = inlined_call_operand.hbm [shape: f32[2,8,256], index: 9, kind: output, shape index: {}]  }
   0x1   :  { %1653 = sst [smem:[#allocation16_spill]] %s1642_s9 }
   0x2   :  { %14 = vsyncpa [#allocation5], 0 }
   0x3   :  { %16 = vsyncpa [#allocation5 + $0x1], 0  ;;  %s1412_s30 = smov 0   ;;  %s1414_s10 = smov 0  }
   0x4   :  { %s1416_s11 = smov 0   ;;  %s1418_s12 = smov 0  }
   0x5   :  { %s1420_s13 = smov 0   ;;  %s1422_s14 = smov 0  }
   0x6   :  { %s1424_s15 = smov 0   ;;  %s1426_s16 = smov 0  }
   0x7 LB: > { %1654 = sst [smem:[#allocation7_spill]] %s1326_s30  ;;  %s1056_s17 = sadd.s32 4294967295, %s1354_s16   ;;  %s1354_s16 = sphi %s1426_s16, %s22_s16   ;;  %s1350_s15 = sphi %s1424_s15, %s1675_s15   ;;  %s1346_s14 = sphi %s1422_s14, %s1674_s14   ;;  %s1342_s13 = sphi %s1420_s13, %s1673_s13   ;;  %s1338_s12 = sphi %s1418_s12, %s1672_s12   ;;  %s1334_s11 = sphi %s1416_s11, %s1671_s11   ;;  %s1330_s10 = sphi %s1414_s10, %s1677_s10   ;;  %s1326_s30 = sphi %s1412_s30, %s1676_s30  }
   0x8   : > { %1655 = sst [smem:[#allocation8_spill]] %s1334_s11  ;;  %s1057_s18 = sadd.s32 4294967294, %s1354_s16  }
   0x9   : > { %1656 = sst [smem:[#allocation9_spill]] %s1346_s14  ;;  %s31_s19 = sadd.s32 1, %s1346_s14 }
   0xa   : > { %1657 = sst [smem:[#allocation10_spill]] %s1350_s15  ;;  %p32_p0 = scmp.ge.s32.totalorder %s31_s19, 4 }
   0xb   : > { %1658 = sst [smem:[#allocation11_spill]] %s1354_s16  ;;  %s34_s20 = sadd.s32 1, %s1350_s15 }
   0xc   : > { %p260_p1 = scmp.ne.s32.totalorder %s1334_s11, %s1330_s10  ;;  %p261_p2 = scmp.eq.s32.totalorder %s1056_s17, 7 }
   0xd   : > { %s1679_s19 = smov (%p32_p0, %s31_s19), 0  ;;  %s1681_s20 = smov (!%p32_p0, %s34_s20), %s1350_s15 }
   0xe   : > { %1659 = sst [smem:[#allocation12_spill]] %s1679_s19  ;;  %p1461_p3 = por %p261_p2, %p260_p1 }
   0xf   : > { %p266_p4 = scmp.ne.s32.totalorder %s1330_s10, %s1326_s30  ;;  %p36_p5 = scmp.ge.s32.totalorder %s1681_s20, 2 }
  0x10   : > { %p267_p6 = scmp.eq.s32.totalorder %s1057_s18, 7  ;;  %p1060_p7 = scmp.ge.s32.totalorder %s1354_s16, 1 }
  0x11   : > { %p331_p8 = scmp.lt.s32.totalorder %s1354_s16, 9  ;;  %s1683_s20 = smov (%p36_p5, %s1681_s20), 0 }
  0x12   : > { %1661 = sst [smem:[#allocation13_spill]] %s1683_s20  ;;  %p1471_p9 = por %p267_p6, %p266_p4 }
  0x13   : > { %p332_p10 = pnand %p1060_p7, %p331_p8  ;;  %s247_s23 = ssub.s32 %s1350_s15, %s1683_s20 }
  0x14   : > { %s1662_s22 = scalar_select %p1471_p9, 1, 0 }
  0x15   : > { %s250_s24 = sadd.s32 1, %s1334_s11  ;;  %p248_p11 = scmp.eq.s32.totalorder %s247_s23, 0 }
  0x16   : > { %1663 = sst [smem:[#allocation14_spill]] %s1662_s22  ;;  %335 = sbr.rel (%p332_p10) target bundleno = 1244 (0x4dc), region = 56 }
  0x17   : > { %s1479_s25 = scalar_select %p248_p11, %s1334_s11, %s250_s24  }
  0x18   : > { %s1648_s26 = sand.u32 (!%p332_p10), 1, %s1330_s10   ;;  %p381_p12 = scmp.lt.s32.totalorder (!%p332_p10), %s1342_s13, 1 }
  0x19   : > { %1664 = sst [smem:[#allocation15_spill]] %s1479_s25  ;;  %s1061_s27 = sshll.u32 (!%p332_p10), %s1648_s26, 4 }
  0x1a   : > { %p386_p13 = scmp.lt.s32.totalorder (!%p332_p10), %s1338_s12, 3  ;;  %s1508_s20 = scalar_lea.vmem (!%p332_p10), [#allocation4], %s1061_s27 }
  0x1b   : > { %p1068_p0 = scmp.ne.s32.totalorder (!%p332_p10), %s1338_s12, 0 }
  0x1d   : > { %s382_s28 = scalar_select %p381_p12, %s1342_s13, 1 }
  0x1e   : > { %s387_s29 = scalar_select %p386_p13, %s1338_s12, 3 }
  0x1f   : > { %s1110_s17 = sshll.u32 %s382_s28, 3  ;;  %404 = sbr.rel (%p1068_p0) target bundleno = 38 (0x26), region = 60  ;;  %v1356_v0 = vmov (!%p1068_p0), 0.0  }
  0x20   : > { %s1491_s23 = scalar_lea.vmem %s1633_s0, %s1110_s17  ;;  %s1064_s24 = sshll.u32 %s387_s29, 2  ;;  %405 = vst [vmem:[#allocation2] sm:$0xff] (!%p1068_p0), %v1356_v0  ;;  %406 = vst [vmem:[#allocation2 + $0x8] sm:$0xff] (!%p1068_p0), %v1356_v0 }
  0x21   : > { %s1496_s14 = scalar_lea.vmem %s1634_s1, %s1064_s24  ;;  %s1111_s25 = sshll.u32 %s387_s29, 7  ;;  %407 = vst [vmem:[#allocation3] sm:$0xff] (!%p1068_p0), %v1356_v0  ;;  %408 = vst [vmem:[#allocation3 + $0x8] sm:$0xff] (!%p1068_p0), %v1356_v0 }
  0x22   : > { %s1501_s26 = scalar_lea.vmem %s1635_s2, %s1111_s25  ;;  %s1143_s30 = smul.u32 40, %s387_s29 }
  0x24   : > { %s1506_s9 = scalar_lea.vmem %s1636_s3, %s1143_s30 }
  0x26 PF: > { %v1221_v1 = vld [vmem:[%s1501_s26 + $0x40] sm:$0xff]   ;;  %v1223_v3 = vld [vmem:[%s1501_s26 + $0x48] sm:$0xff]   ;;  %v1225_v5 = vld [vmem:[%s1501_s26 + $0x50] sm:$0xff]   ;;  %v1357_v20 = vmov 0.0   ;;  %vm1358_vm0 = vmmov 0   ;;  %vm591_vm1 = vcmask 1043456  }
  0x27   : > { %v1222_v2 = vld [vmem:[%s1501_s26] sm:$0xff]   ;;  %1113 = vmatprep.subr.bf16.mxu0 %v1221_v1  ;;  %v1224_v4 = vld [vmem:[%s1501_s26 + $0x8] sm:$0xff]   ;;  %v1226_v6 = vld [vmem:[%s1501_s26 + $0x10] sm:$0xff]   ;;  %1137 = vmatprep.subr.bf16.mxu1 %v1357_v20  ;;  %vm587_vm2 = vcmask 64512   ;;  %vm670_vm3 = vcmask 1041408   ;;  %v1359_v37 = vmov 0  }
  0x28   : > { %1114 = vmatpush3.bf16.msra.mxu0 %v1222_v2  ;;  %v1227_v7 = vld [vmem:[%s1501_s26 + $0x58] sm:$0xff]   ;;  %v1229_v9 = vld [vmem:[%s1501_s26 + $0x60] sm:$0xff]   ;;  %v1231_v11 = vld [vmem:[%s1501_s26 + $0x68] sm:$0xff]   ;;  %1139 = vmatprep.mubr.msk.bf16.mxu1 %vm1358_vm0, %v1357_v20  ;;  %vm666_vm4 = vcmask 293888   ;;  %p1100_p1 = scmp.ne.s32.totalorder %s1338_s12, 3 }
  0x29   : > { %1115 = vmatprep.subr.bf16.mxu0 %v1223_v3  ;;  %v1228_v8 = vld [vmem:[%s1501_s26 + $0x18] sm:$0xff]   ;;  %v1230_v10 = vld [vmem:[%s1501_s26 + $0x20] sm:$0xff]   ;;  %v1232_v14 = vld [vmem:[%s1501_s26 + $0x28] sm:$0xff]   ;;  %1220 = vset.pattern.permute.xlu0 %v1359_v37 }
  0x2a   : > { %v1523_v12 = vld [vmem:[%s1491_s23] sm:$0xff]  ;;  %v1233_v15 = vld [vmem:[%s1501_s26 + $0x70] sm:$0xff]   ;;  %v1235_v17 = vld [vmem:[%s1501_s26 + $0x78] sm:$0xff]  }
  0x2b   : > { %v1527_v13 = vcombine.high %v1523_v12, %v1523_v12  ;;  %v1234_v16 = vld [vmem:[%s1501_s26 + $0x30] sm:$0xff]   ;;  %v1236_v18 = vld [vmem:[%s1501_s26 + $0x38] sm:$0xff]   ;;  %v1537_v19 = vcombine.low %v1523_v12, %v1523_v12  ;;  %v1241_v27 = vld [vmem:[%s1506_s9 + $0x4] ss:$8 sps:$4 sm:$0xff]   ;;  %v718_v44 = vunpack.c.l.bf16 %v1523_v12  ;;  %v719_v45 = vunpack.c.h.bf16 %v1523_v12 }
  0x2c   : > { %1116 = vmatpush3.bf16.msra.mxu0 %v1224_v4  ;;  %v585_v29 = vld [vmem:[%s1496_s14] sm:$0xf]  ;;  %v1244_v31 = vld [vmem:[%s1506_s9 + $0x14] ss:$8 sps:$4 sm:$0xff]   ;;  %v1242_v33 = vld [vmem:[%s1506_s9 + $0x10] ss:$8 sps:$4 sm:$0xff]  }
  0x2d   : > { %1117 = vmatprep.subr.bf16.mxu0 %v1225_v5  ;;  %577 = vmatprep.mubr.bf16.mxu0 %v1527_v13  ;;  %v1239_v30 = vld [vmem:[%s1506_s9] ss:$8 sps:$4 sm:$0xff]   ;;  %v801_v5 = vld [vmem:[#allocation3] sm:$0xff] }
  0x2e   : > { %v640_v32 = vld [vmem:[%s1506_s9 + $0x20] sm:$0x33]  ;;  %v794_v12 = vld [vmem:[#allocation2 + $0x8] sm:$0xff] }
  0x2f   : > { %v1093_v34 = vcombine.high %v640_v32, %v640_v32  ;;  %v1092_v35 = vcombine.low %v640_v32, %v640_v32  ;;  %v725_v43 = vld [vmem:[%s1638_s5] sm:$0xff] }
  0x30   : > { %1118 = vmatpush3.bf16.msra.mxu0 %v1226_v6  ;;  %728 = vperm.xlu0 %1220, %v725_v43   ;;  %v724_v55 = vld [vmem:[%s1637_s4] sm:$0xf]  ;;  %v802_v6 = vld [vmem:[#allocation3 + $0x8] sm:$0xff] }
  0x31   : > { %1119 = vmatprep.subr.bf16.mxu0 %v1227_v7  ;;  %v672_v36 = vsel %vm670_vm3, %v1092_v35, 0  ;;  %v819_v32 = vld [vmem:[%s1639_s6] sm:$0xf] (!%p1100_p1) }
  0x34   : > { %1120 = vmatpush3.bf16.msra.mxu0 %v1228_v8  ;;  %v793_v8 = vld [vmem:[#allocation2] sm:$0xff] }
  0x35   : > { %1121 = vmatprep.subr.bf16.mxu0 %v1229_v9 }
  0x38   : > { %1122 = vmatpush3.bf16.msra.mxu0 %v1230_v10 }
  0x39   : > { %1123 = vmatprep.subr.bf16.mxu0 %v1231_v11 }
  0x3c   : > { %1124 = vmatpush3.bf16.msra.mxu0 %v1232_v14 }
  0x3d   : > { %1125 = vmatprep.subr.bf16.mxu0 %v1233_v15 }
  0x40   : > { %1126 = vmatpush3.bf16.msra.mxu0 %v1234_v16 }
  0x41   : > { %1127 = vmatprep.subr.bf16.mxu0 %v1235_v17 }
  0x44   : > { %1128 = vmatpush3.bf16.msra.mxu0 %v1236_v18  ;;  %v827_v18 = vsel (!%p1100_p1), %vm591_vm1, %v1537_v19, 0 }
  0x45   : > { %1101 = vmatprep.subr.msk.bf16.mxu0 (!%p1100_p1), %vm591_vm1, %v1527_v13  ;;  %v923_v13 = vld [vmem:[%s1641_s8] sm:$0xff] (!%p1100_p1) }
  0x47   : > { %578 = vmatmul.mubr.bf16.vlgmr.msra.gmra.mrb[0].mxu0 %v1537_v19 }
  0x48   : > { %833 = vmatpush1.bf16.msra.mxu0 (!%p1100_p1), %v827_v18 }
  0xaf   : > { %v729_v56 = vpop.permute.xlu0 %728 }
 0x11a   : > { %v1129_v21 = vpop.f32.mrb[0].mxu0 }
 0x11b   : > { %v1130_v22 = vpop.f32.mrb[1].mxu0 }
 0x11c   : > { %v1131_v23 = vadd.f32 %v1130_v22, %v1129_v21  ;;  %v1132_v24 = vpop.f32.mrb[2].mxu0  ;;  %v1360_v21 = vmov (!%p1100_p1), 0   ;;  %v822_v22 = vld [vmem:[%s1640_s7] sm:$0xf] (!%p1100_p1) }
 0x11d   : > { %v1133_v25 = vpop.f32.mrb[3].mxu0  ;;  %864 = vmatprep.mubr.bf16.mxu0 (!%p1100_p1), %v1360_v21  ;;  %1255 = vset.pattern.permute.xlu0 (!%p1100_p1), %v1360_v21 }
 0x11e   : > { %v586_v26 = vpack.c.bf16 %v1131_v23, %v1131_v23  ;;  %926 = vperm.xlu0 (!%p1100_p1), %1255, %v923_v13   ;;  %1102 = vmatmul.mubr.msk.bf16.vlgmr.msra.gmra.mrb[0].mxu0 (!%p1100_p1), %vm587_vm2, %v822_v22 }
 0x120   : > { %v593_v28 = vsel %vm591_vm1, %v586_v26, 0 }
 0x121   : > { %1138 = vmatpush3.bf16.msra.mxu1 %v593_v28 }
 0x122   : > { %677 = vmatprep.subr.bf16.mxu1 %v1241_v27 }
 0x124   : > { %1140 = vmatmul.mubr.msk.bf16.vlgmr.msra.gmra.mrb[0].mxu1 %vm587_vm2, %v585_v29 }
 0x125   : > { %678 = vmatpush1.bf16.msra.mxu1 %v1239_v30  ;;  %709 = vmatprep.mubr.bf16.mxu1 %v1359_v37 }
 0x126   : > { %679 = vmatprep.subr.bf16.mxu1 %v1244_v31 }
 0x129   : > { %680 = vmatpush1.bf16.msra.mxu1 %v1242_v33 }
 0x12a   : > { %1094 = vmatprep.subr.msk.bf16.mxu1 %vm670_vm3, %v1093_v34 }
 0x12d   : > { %682 = vmatpush1.bf16.msra.mxu1 %v672_v36 }
 0x1f1   : > { %v866_v33 = vpop.f32.mrb[0].mxu0 (!%p1100_p1) }
 0x1f2   : > { %v868_v34 = vpop.f32.mrb[1].mxu0 (!%p1100_p1) }
 0x1f3   : > { %v870_v35 = vpop.f32.mrb[2].mxu0 (!%p1100_p1) }
 0x1f4   : > { %v871_v36 = vpop.f32.mrb[3].mxu0 (!%p1100_p1) }
 0x1f7   : > { %v629_v38 = vpop.f32.mrb[0].mxu1 }
 0x1f8   : > { %v635_v39 = vpack.c.bf16 %v629_v38, %v629_v38  ;;  %v1141_v40 = vpop.f32.mrb[1].mxu1  ;;  %v927_v38 = vpop.permute.xlu0 (!%p1100_p1), %926 }
 0x1f9   : > { %v632_v41 = vpop.f32.mrb[2].mxu1 }
 0x1fa   : > { %v1142_v42 = vpop.f32.mrb[3].mxu1  ;;  %1095 = vmatmul.mubr.msk.bf16.vlgmr.msra.gmra.mrb[4].mxu1 %vm666_vm4, %v635_v39 }
 0x1fb   : > { %772 = vmatprep.mubr.bf16.mxu1 %v1359_v37 }
 0x2cd   : > { %v711_v46 = vpop.f32.mrb[4].mxu1 }
 0x2ce   : > { %v720_v47 = vsub.f32 %v718_v44, %v711_v46  ;;  %v713_v48 = vpop.f32.mrb[5].mxu1 }
 0x2cf   : > { %v721_v49 = vsub.f32 %v719_v45, %v713_v48  ;;  %v715_v50 = vpop.f32.mrb[6].mxu1 }
 0x2d0   : > { %v722_v51 = vpack.c.bf16 %v720_v47, %v720_v47  ;;  %v716_v52 = vpop.f32.mrb[7].mxu1 }
 0x2d1   : > { %v723_v53 = vpack.c.bf16 %v721_v49, %v721_v49 }
 0x2d2   : > { %v735_v54 = vsel %vm591_vm1, %v722_v51, 0 }
 0x2d3   : > { %1096 = vmatprep.subr.msk.bf16.mxu1 %vm591_vm1, %v723_v53 }
 0x2d4   : > { %741 = vmatpush1.bf16.msra.mxu1 %v735_v54 }
 0x2d7   : > { %1097 = vmatmul.mubr.msk.bf16.vlgmr.msra.gmra.mrb[8].mxu1 %vm587_vm2, %v724_v55 }
 0x2d8   : > { %914 = vmatprep.mubr.bf16.mxu1 (!%p1100_p1), %v1360_v21 }
 0x3aa   : > { %v774_v57 = vpop.f32.mrb[8].mxu1 }
 0x3ab   : > { %v775_v58 = vadd.f32 %v774_v57, %v729_v56  ;;  %v776_v59 = vpop.f32.mrb[9].mxu1 }
 0x3ac   : > { %v777_v60 = vadd.f32 %v776_v59, %v729_v56  ;;  %v778_v61 = vpop.f32.mrb[10].mxu1 }
 0x3ad   : > { %v1098_v62 = vmul.f32 -1.442695, %v775_v58  ;;  %v779_v63 = vpop.f32.mrb[11].mxu1 }
 0x3ae   : > { %v1099_v0 = vmul.f32 -1.442695, %v777_v60 }
 0x3af   : > { %1247 = vpow2.f32 %v1098_v62 }
 0x3b0   : > { %1249 = vpow2.f32 %v1099_v0 }
 0x3b9   : > { %v1248_v1 = vpop.eup %1247 }
 0x3ba   : > { %v1250_v2 = vpop.eup %1249  ;;  %v787_v3 = vadd.f32 1.0, %v1248_v1 }
 0x3bb   : > { %v788_v4 = vadd.f32 1.0, %v1250_v2 }
 0x3bc   : > { %1251 = vrcp.f32 %v787_v3 }
 0x3bd   : > { %1253 = vrcp.f32 %v788_v4 }
 0x3c6   : > { %v1252_v7 = vpop.eup %1251  ;;  %810 = sbr.rel (%p1100_p1) target bundleno = 1218 (0x4c2), region = 64 }
 0x3c7   : > { %v1254_v9 = vpop.eup %1253  ;;  %v795_v10 = vmul.f32 %v1252_v7, %v711_v46  ;;  %v803_v11 = vadd.f32 %v1252_v7, %v801_v5 }
 0x3c8   : > { %v796_v14 = vmul.f32 %v1254_v9, %v713_v48  ;;  %v804_v15 = vadd.f32 %v1254_v9, %v802_v6 }
 0x3c9   : > { %v797_v16 = vadd.f32 %v795_v10, %v793_v8  ;;  %805 = vst [vmem:[#allocation3] sm:$0xff] %v803_v11 }
 0x3ca   : > { %v798_v17 = vadd.f32 %v796_v14, %v794_v12  ;;  %806 = vst [vmem:[#allocation3 + $0x8] sm:$0xff] %v804_v15 }
 0x3cb   : > { %799 = vst [vmem:[#allocation2] sm:$0xff] %v797_v16 }
 0x3cc   : > { %800 = vst [vmem:[#allocation2 + $0x8] sm:$0xff] %v798_v17 }
 0x3d0   : > { %v813_v23 = vld [vmem:[#allocation3] sm:$0xff] }
 0x3d1   : > { %v814_v20 = vld [vmem:[#allocation3 + $0x8] sm:$0xff] }
 0x3d2   : > { %1256 = vrcp.f32 %v814_v20  ;;  %v811_v24 = vld [vmem:[#allocation2] sm:$0xff] }
 0x3d3   : > { %1258 = vrcp.f32 %v813_v23  ;;  %v812_v19 = vld [vmem:[#allocation2 + $0x8] sm:$0xff] }
 0x3dc   : > { %v1257_v25 = vpop.eup %1256 }
 0x3dd   : > { %v1259_v26 = vpop.eup %1258  ;;  %v818_v27 = vmul.f32 %v1257_v25, %v812_v19 }
 0x3de   : > { %v817_v28 = vmul.f32 %v1259_v26, %v811_v24 }
 0x3df   : > { %v821_v29 = vpack.c.bf16 %v818_v27, %v818_v27 }
 0x3e0   : > { %v820_v30 = vpack.c.bf16 %v817_v28, %v817_v28 }
 0x3e1   : > { %1103 = vmatprep.subr.msk.bf16.mxu1 %vm591_vm1, %v821_v29 }
 0x3e2   : > { %v877_v31 = vsel %vm591_vm1, %v820_v30, 0 }
 0x3e3   : > { %883 = vmatpush1.bf16.msra.mxu1 %v877_v31 }
 0x3e6   : > { %1104 = vmatmul.mubr.msk.bf16.vlgmr.msra.gmra.mrb[0].mxu1 %vm587_vm2, %v819_v32 }
 0x4b9   : > { %v916_v37 = vpop.f32.mrb[0].mxu1 }
 0x4ba   : > { %v917_v39 = vadd.f32 %v916_v37, %v866_v33  ;;  %v918_v40 = vpop.f32.mrb[1].mxu1 }
 0x4bb   : > { %v919_v41 = vadd.f32 %v918_v40, %v868_v34  ;;  %v920_v42 = vpop.f32.mrb[2].mxu1 }
 0x4bc   : > { %v929_v43 = vadd.f32 %v927_v38, %v917_v39  ;;  %v921_v44 = vpop.f32.mrb[3].mxu1 }
 0x4bd   : > { %v930_v45 = vadd.f32 %v927_v38, %v919_v41 }
 0x4be   : > { %v931_v46 = vmax.f32 %v929_v43, 0.0 }
 0x4bf   : > { %v932_v47 = vmax.f32 %v930_v45, 0.0 }
 0x4c0   : > { %933 = vst [vmem:[%s1508_s20] sm:$0xff] %v931_v46 }
 0x4c1   : > { %934 = vst [vmem:[%s1508_s20 + $0x8] sm:$0xff] %v932_v47 }
 0x4c2 PF: > { %s1112_s26 = sshll.u32 %s1342_s13, 8  ;;  %s1665_s17 = sld [smem:[#allocation16_spill]] }
 0x4c3   : > { %s950_s23 = sshll.u32 %s1508_s20, 4  ;;  %s1666_s24 = sand.u32 1, %s1330_s10   ;;  %s951_s23 = int_to_ptr.vmem [resolvable:$true] %s950_s23 }
 0x4c4   : > { %s936_s28 = scalar_lea.sflag [#allocation5], %s1666_s24  ;;  %s1260_s9 = scalar_lea.vmem %s951_s23, 256 }
 0x4c5   : > { %p1261_p2 = scmp.ne.s32.totalorder %s951_s23, %s1260_s9  ;;  %s1361_s30 = smov [#allocation4]  }
 0x4c6   : > { %s1264_s11 = sshll.u32 %s1361_s30, 4  ;;  %s1265_s11 = int_to_ptr.vmem [resolvable:$false] %s1264_s11 }
 0x4c7   : > { %p1262_p4 = pnand %p1261_p2, %p1461_p3  ;;  %s1266_s14 = scalar_lea.vmem %s1265_s11, 512 }
 0x4c8   : > { %s1583_s18 = scalar_lea.hbm %s1665_s17, %s1112_s26  ;;  %p1267_p6 = scmp.lt.s32.totalorder %s951_s23, %s1265_s11 }
 0x4c9   : > { %p1263_p5 = pneg %p1262_p4  ;;  %p1268_p7 = scmp.lt.s32.totalorder %s1266_s14, %s1260_s9 }
 0x4cb   : > { %p1269_p8 = por %p1268_p7, %p1267_p6 }
 0x4cd   : > { %p1270_p10 = pnand %p1269_p8, %p1263_p5 }
 0x4cf   : > { %1273 = shalt.err (!%p1270_p10)
}
 0x4d0   : > { %s1274_s13 = scalar_lea.hbm %s1583_s18, 256  ;;  %s1278_s16 = scalar_lea.hbm %s1665_s17, 512 }
 0x4d1   : > { %p1275_p11 = scmp.ne.s32.totalorder %s1583_s18, %s1274_s13  ;;  %p1279_p0 = scmp.lt.u32.totalorder %s1583_s18, %s1665_s17 }
 0x4d2   : > { %p1280_p1 = scmp.lt.u32.totalorder %s1278_s16, %s1274_s13  ;;  %p1282_p4 = scmp.lt.u32.totalorder %s1274_s13, %s1583_s18 }
 0x4d3   : > { %p1276_p12 = pnand %p1275_p11, %p1461_p3 }
 0x4d4   : > { %p1281_p2 = por %p1280_p1, %p1279_p0 }
 0x4d5   : > { %p1277_p13 = pneg %p1276_p12 }
 0x4d6   : > { %p1283_p5 = por %p1282_p4, %p1281_p2 }
 0x4d8   : > { %p1284_p6 = pnand %p1283_p5, %p1277_p13 }
 0x4da   : > { %1287 = shalt.err (!%p1284_p6)
}
 0x4db   : > { %1144 = dma.vmem_to_hbm [thread:$0]  (%p1461_p3), %s951_s23, 256, %s1583_s18, %s936_s28  }
 0x4dc PF: > { %s1667_s22 = sld [smem:[#allocation11_spill]]  ;;  %s1668_s25 = sld [smem:[#allocation7_spill]] }
 0x4e2   : > { %p1150_p7 = scmp.ge.s32.totalorder %s1667_s22, 2  ;;  %s962_s27 = sand.u32 1, %s1668_s25  }
 0x4e3   : > { %s963_s29 = scalar_lea.sflag [#allocation5], %s962_s27 }
 0x4e4   : > { %p1147_p8 = pnand %p1150_p7, %p1471_p9 }
 0x4e6   : > { %1321 = dma.done.wait (!%p1147_p8), %s963_s29, 256  }
 0x4e7   : > { %1323 = vsyncadd (!%p1147_p8), %s963_s29, 4294967040  ;;  %s22_s16 = sadd.s32 1, %s1667_s22   ;;  %s1670_s24 = sld [smem:[#allocation8_spill]] }
 0x4e8   : > { %p19_p10 = scmp.ge.s32.totalorder %s22_s16, 10   ;;  %s1671_s11 = sld [smem:[#allocation15_spill]] }
 0x4e9   : > { %s1672_s12 = sld [smem:[#allocation9_spill]]  ;;  %s1673_s13 = sld [smem:[#allocation10_spill]] }
 0x4ea   : > { %s1674_s14 = sld [smem:[#allocation12_spill]]  ;;  %s1675_s15 = sld [smem:[#allocation13_spill]] }
 0x4eb   : > { %s1676_s30 = smov %s1330_s10  ;;  %21 = sbr.rel (!%p19_p10) target bundleno = 7 (0x7), region = 108 }
 0x4ed   : > { %s1677_s10 = smov %s1670_s24 }
 0x4f2   :  { %968 = vsyncpa [#allocation5], 1 }
 0x4f3   :  { %970 = vsyncpa [#allocation5 + $0x1], 1 }

</bundles_post_ra>
